<compile_context>
chip_gen: v6e
topology: v6e:2x2x1
jax: 0.10.0
libtpu: 0.0.40
codegen_flags: <defaults>
</compile_context>

<pallas_src>
import functools

import jax
import jax.numpy as jnp
from jax.experimental import pallas as pl
from jax.experimental.pallas import tpu as pltpu

EPS = 1e-5
LANE = 128  # vreg lane width


# ----------------------------- Pallas kernel ------------------------------


def byol_fused_kernel(
    patch_ref, conv_w_ref, bn0_g_ref, bn0_b_ref,
    pw1_ref, pg_ref, pb_ref, pw2_ref, pb2_ref,
    qw1_ref, qg_ref, qb_ref, qw2_ref, qb2_ref,
    h_ref, z_ref, q_ref,
    *, n, p,
):
    """Fused BYOL forward.

    conv stem : im2col-matmul conv1 -> BatchNorm2d (batch stats) -> ReLU -> global avg pool
    each head : Linear(no bias) -> BatchNorm1d (batch stats) -> ReLU -> Linear(+bias)

    patch_ref : [N*P, K_pad]     conv_w_ref : [K_pad, C_pad]
    pw1_ref   : [C_pad, H]       pw2_ref    : [H, Z_pad]
    qw1_ref   : [Z_pad, H]       qw2_ref    : [H, Z_pad]
    h_ref     : [N, C_pad]       z_ref/q_ref: [N, Z_pad]
    Zero-padded channels stay exactly zero through every stage.
    """

    def bn_relu(y, g, b):
        mean = jnp.mean(y, axis=0, keepdims=True)
        var = jnp.mean(jnp.square(y - mean), axis=0, keepdims=True)  # biased, torch train mode
        return jnp.maximum((y - mean) * jax.lax.rsqrt(var + EPS) * g + b, 0.0)

    # ---- backbone stem: conv1 (im2col matmul) -> BN2d -> ReLU -> global avg pool ----
    y = jnp.dot(patch_ref[...], conv_w_ref[...], preferred_element_type=jnp.float32)
    yr = bn_relu(y, bn0_g_ref[...], bn0_b_ref[...])
    # per-sample spatial mean: [N*P, C] -> [N, P, C] -> mean over P (XLU reduction).
    h = jnp.mean(yr.reshape(n, p, yr.shape[-1]), axis=1)
    h_ref[...] = h

    # ---- projection head ----
    t = bn_relu(jnp.dot(h, pw1_ref[...], preferred_element_type=jnp.float32),
                pg_ref[...], pb_ref[...])
    z = jnp.dot(t, pw2_ref[...], preferred_element_type=jnp.float32) + pb2_ref[...]
    z_ref[...] = z

    # ---- predictor ----
    u = bn_relu(jnp.dot(z, qw1_ref[...], preferred_element_type=jnp.float32),
                qg_ref[...], qb_ref[...])
    q_ref[...] = jnp.dot(u, qw2_ref[...], preferred_element_type=jnp.float32) + qb2_ref[...]


def _vmem_spec():
    return pl.BlockSpec(memory_space=pltpu.MemorySpace.VMEM)


def byol_fused(patches, conv_w, bn0_g, bn0_b,
               pw1, pg, pb, pw2, pb2,
               qw1, qg, qb, qw2, qb2, *, n, p):
    c_pad = conv_w.shape[1]
    z_pad = pw2.shape[1]
    kernel = functools.partial(byol_fused_kernel, n=n, p=p)
    return pl.pallas_call(
        kernel,
        out_shape=(
            jax.ShapeDtypeStruct((n, c_pad), jnp.float32),
            jax.ShapeDtypeStruct((n, z_pad), jnp.float32),
            jax.ShapeDtypeStruct((n, z_pad), jnp.float32),
        ),
        in_specs=[_vmem_spec() for _ in range(14)],
        out_specs=(_vmem_spec(), _vmem_spec(), _vmem_spec()),
    )(patches, conv_w, bn0_g, bn0_b, pw1, pg, pb, pw2, pb2, qw1, qg, qb, qw2, qb2)


# --------------------------------- Glue -------------------------------------


def _round_up(x, m):
    return (x + m - 1) // m * m


def _pad2(x, rows, cols):
    """Zero-pad a 2D array up to (rows, cols)."""
    return jnp.pad(x, ((0, rows - x.shape[0]), (0, cols - x.shape[1])))


def im2col_7x7_s2_p3(x_nhwc):
    """Extract 7x7 / stride 2 / pad 3 patches. Returns [N, Hout*Wout, 49*Cin]."""
    n, h, w, cin = x_nhwc.shape
    hout = (h + 2 * 3 - 7) // 2 + 1
    wout = (w + 2 * 3 - 7) // 2 + 1
    xp = jnp.pad(x_nhwc, ((0, 0), (3, 3), (3, 3), (0, 0)))
    slabs = []
    for di in range(7):
        for dj in range(7):
            slabs.append(xp[:, di : di + 2 * hout : 2, dj : dj + 2 * wout : 2, :])
    # [N, Hout, Wout, 49, Cin] -> [N, Hout*Wout, 49*Cin]   (kh*kw outer, Cin inner)
    patches = jnp.stack(slabs, axis=-2)
    return patches.reshape(n, hout * wout, 49 * cin), hout, wout


def init_params(key, cin=3, h_dim=64, hidden=128, z_dim=32):
    ks = jax.random.split(key, 7)
    k_conv = 49 * cin
    params = {
        # backbone stem
        "conv_w": jax.random.normal(ks[0], (k_conv, h_dim), jnp.float32) / jnp.sqrt(k_conv),
        "bn0_g": jnp.ones((1, h_dim), jnp.float32),
        "bn0_b": jnp.zeros((1, h_dim), jnp.float32),
        # projection head
        "proj_w1": jax.random.normal(ks[1], (h_dim, hidden), jnp.float32) / jnp.sqrt(h_dim),
        "proj_g": jnp.ones((1, hidden), jnp.float32),
        "proj_b": jnp.zeros((1, hidden), jnp.float32),
        "proj_w2": jax.random.normal(ks[2], (hidden, z_dim), jnp.float32) / jnp.sqrt(hidden),
        "proj_b2": jax.random.normal(ks[3], (1, z_dim), jnp.float32) * 0.01,
        # predictor
        "pred_w1": jax.random.normal(ks[4], (z_dim, hidden), jnp.float32) / jnp.sqrt(z_dim),
        "pred_g": jnp.ones((1, hidden), jnp.float32),
        "pred_b": jnp.zeros((1, hidden), jnp.float32),
        "pred_w2": jax.random.normal(ks[5], (hidden, z_dim), jnp.float32) / jnp.sqrt(hidden),
        "pred_b2": jax.random.normal(ks[6], (1, z_dim), jnp.float32) * 0.01,
    }
    return params


def byol_forward(params, images_nchw):
    n = images_nchw.shape[0]
    h_dim = params["conv_w"].shape[1]
    hidden = params["proj_w1"].shape[1]
    z_dim = params["proj_w2"].shape[1]

    # NCHW -> NHWC, im2col the conv1 patches (glue).
    x = jnp.transpose(images_nchw, (0, 2, 3, 1)).astype(jnp.float32)
    patches, hout, wout = im2col_7x7_s2_p3(x)
    p = hout * wout
    k_raw = patches.shape[-1]

    # Lane-align every contraction / feature dim (zero padding keeps semantics exact).
    k_pad = _round_up(k_raw, LANE)
    c_pad = _round_up(h_dim, LANE)
    hid_pad = _round_up(hidden, LANE)
    z_pad = _round_up(z_dim, LANE)

    patches_flat = _pad2(patches.reshape(n * p, k_raw), n * p, k_pad)
    conv_w = _pad2(params["conv_w"], k_pad, c_pad)
    bn0_g = _pad2(params["bn0_g"], 1, c_pad)
    bn0_b = _pad2(params["bn0_b"], 1, c_pad)
    pw1 = _pad2(params["proj_w1"], c_pad, hid_pad)
    pg = _pad2(params["proj_g"], 1, hid_pad)
    pb = _pad2(params["proj_b"], 1, hid_pad)
    pw2 = _pad2(params["proj_w2"], hid_pad, z_pad)
    pb2 = _pad2(params["proj_b2"], 1, z_pad)
    qw1 = _pad2(params["pred_w1"], z_pad, hid_pad)
    qg = _pad2(params["pred_g"], 1, hid_pad)
    qb = _pad2(params["pred_b"], 1, hid_pad)
    qw2 = _pad2(params["pred_w2"], hid_pad, z_pad)
    qb2 = _pad2(params["pred_b2"], 1, z_pad)

    h_pad, z_padded, q_padded = byol_fused(
        patches_flat, conv_w, bn0_g, bn0_b,
        pw1, pg, pb, pw2, pb2,
        qw1, qg, qb, qw2, qb2,
        n=n, p=p,
    )
    # Slice the padded lanes back to the logical dims.
    return h_pad[:, :h_dim], z_padded[:, :z_dim], q_padded[:, :z_dim]


if __name__ == "__main__":
    key = jax.random.PRNGKey(0)
    k_img, k_par = jax.random.split(key)
    images = jax.random.normal(k_img, (2, 3, 16, 16), jnp.float32)  # NCHW like PyTorch
    params = init_params(k_par)

    h, z, q = jax.jit(byol_forward)(params, images)
    jax.block_until_ready((h, z, q))

    assert h.shape == (2, 64) and z.shape == (2, 32) and q.shape == (2, 32)
    assert jnp.all(jnp.isfinite(h)) and jnp.all(jnp.isfinite(z)) and jnp.all(jnp.isfinite(q))
    print("KERNEL_OK")
</pallas_src>

<mosaic_0001>
module attributes {stable_mosaic.version = 11 : i64} {
  func.func @byol_fused_kernel(%arg0: memref<128x256xf32, #tpu.memory_space<vmem>>, %arg1: memref<256x128xf32, #tpu.memory_space<vmem>>, %arg2: memref<1x128xf32, #tpu.memory_space<vmem>>, %arg3: memref<1x128xf32, #tpu.memory_space<vmem>>, %arg4: memref<128x128xf32, #tpu.memory_space<vmem>>, %arg5: memref<1x128xf32, #tpu.memory_space<vmem>>, %arg6: memref<1x128xf32, #tpu.memory_space<vmem>>, %arg7: memref<128x128xf32, #tpu.memory_space<vmem>>, %arg8: memref<1x128xf32, #tpu.memory_space<vmem>>, %arg9: memref<128x128xf32, #tpu.memory_space<vmem>>, %arg10: memref<1x128xf32, #tpu.memory_space<vmem>>, %arg11: memref<1x128xf32, #tpu.memory_space<vmem>>, %arg12: memref<128x128xf32, #tpu.memory_space<vmem>>, %arg13: memref<1x128xf32, #tpu.memory_space<vmem>>, %arg14: memref<2x128xf32, #tpu.memory_space<vmem>>, %arg15: memref<2x128xf32, #tpu.memory_space<vmem>>, %arg16: memref<2x128xf32, #tpu.memory_space<vmem>>) attributes {dimension_semantics = [], scalar_prefetch = 0 : i64, scratch_operands = 0 : i64, tpu.core_type = #tpu.core_type<tc>} {
    %c0 = arith.constant 0 : index
    %c0_0 = arith.constant 0 : index
    %0 = vector.load %arg0[%c0, %c0_0] : memref<128x256xf32, #tpu.memory_space<vmem>>, vector<128x256xf32>
    %c0_1 = arith.constant 0 : index
    %c0_2 = arith.constant 0 : index
    %1 = vector.load %arg1[%c0_1, %c0_2] : memref<256x128xf32, #tpu.memory_space<vmem>>, vector<256x128xf32>
    %cst = arith.constant dense<0.000000e+00> : vector<128x128xf32>
    %2 = tpu.matmul %0, %1, %cst {dimension_numbers = #tpu.dot_dimension_numbers<[1], [0], [0], [1], [0, 0, 1, 1], [], []>} : vector<128x256xf32>, vector<256x128xf32>, vector<128x128xf32> -> vector<128x128xf32>
    %c0_3 = arith.constant 0 : index
    %c0_4 = arith.constant 0 : index
    %3 = vector.load %arg2[%c0_3, %c0_4] : memref<1x128xf32, #tpu.memory_space<vmem>>, vector<1x128xf32>
    %c0_5 = arith.constant 0 : index
    %c0_6 = arith.constant 0 : index
    %4 = vector.load %arg3[%c0_5, %c0_6] : memref<1x128xf32, #tpu.memory_space<vmem>>, vector<1x128xf32>
    %cst_7 = arith.constant dense<0.000000e+00> : vector<128xf32>
    %5 = vector.multi_reduction <add>, %2, %cst_7 [0] : vector<128x128xf32> to vector<128xf32>
    %6 = vector.shape_cast %5 : vector<128xf32> to vector<1x128xf32>
    %cst_8 = arith.constant 1.280000e+02 : f32
    %7 = vector.broadcast %cst_8 : f32 to vector<1x128xf32>
    %8 = arith.divf %6, %7 : vector<1x128xf32>
    %9 = vector.broadcast %8 : vector<1x128xf32> to vector<128x128xf32>
    %10 = arith.subf %2, %9 : vector<128x128xf32>
    %11 = arith.mulf %10, %10 : vector<128x128xf32>
    %cst_9 = arith.constant dense<0.000000e+00> : vector<128xf32>
    %12 = vector.multi_reduction <add>, %11, %cst_9 [0] : vector<128x128xf32> to vector<128xf32>
    %13 = vector.shape_cast %12 : vector<128xf32> to vector<1x128xf32>
    %cst_10 = arith.constant 1.280000e+02 : f32
    %14 = vector.broadcast %cst_10 : f32 to vector<1x128xf32>
    %15 = arith.divf %13, %14 : vector<1x128xf32>
    %16 = vector.broadcast %8 : vector<1x128xf32> to vector<128x128xf32>
    %17 = arith.subf %2, %16 : vector<128x128xf32>
    %cst_11 = arith.constant 9.99999974E-6 : f32
    %18 = vector.broadcast %cst_11 : f32 to vector<1x128xf32>
    %19 = arith.addf %15, %18 : vector<1x128xf32>
    %20 = math.rsqrt %19 : vector<1x128xf32>
    %21 = vector.broadcast %20 : vector<1x128xf32> to vector<128x128xf32>
    %22 = arith.mulf %17, %21 : vector<128x128xf32>
    %23 = vector.broadcast %3 : vector<1x128xf32> to vector<128x128xf32>
    %24 = arith.mulf %22, %23 : vector<128x128xf32>
    %25 = vector.broadcast %4 : vector<1x128xf32> to vector<128x128xf32>
    %26 = arith.addf %24, %25 : vector<128x128xf32>
    %cst_12 = arith.constant 0.000000e+00 : f32
    %27 = vector.broadcast %cst_12 : f32 to vector<128x128xf32>
    %28 = arith.maximumf %26, %27 : vector<128x128xf32>
    %29 = vector.shape_cast %28 : vector<128x128xf32> to vector<2x64x128xf32>
    %cst_13 = arith.constant dense<0.000000e+00> : vector<2x128xf32>
    %30 = vector.multi_reduction <add>, %29, %cst_13 [1] : vector<2x64x128xf32> to vector<2x128xf32>
    %cst_14 = arith.constant 6.400000e+01 : f32
    %31 = vector.broadcast %cst_14 : f32 to vector<2x128xf32>
    %32 = arith.divf %30, %31 : vector<2x128xf32>
    %c0_15 = arith.constant 0 : index
    %c0_16 = arith.constant 0 : index
    %33 = vector.load %arg14[%c0_15, %c0_16] : memref<2x128xf32, #tpu.memory_space<vmem>>, vector<2x128xf32>
    tpu.vector_store %arg14[%c0_15, %c0_16], %32 {strides = array<i32>} : memref<2x128xf32, #tpu.memory_space<vmem>>, vector<2x128xf32>,
    %c0_17 = arith.constant 0 : index
    %c0_18 = arith.constant 0 : index
    %34 = vector.load %arg4[%c0_17, %c0_18] : memref<128x128xf32, #tpu.memory_space<vmem>>, vector<128x128xf32>
    %cst_19 = arith.constant dense<0.000000e+00> : vector<2x128xf32>
    %35 = tpu.matmul %32, %34, %cst_19 {dimension_numbers = #tpu.dot_dimension_numbers<[1], [0], [0], [1], [0, 0, 1, 1], [], []>} : vector<2x128xf32>, vector<128x128xf32>, vector<2x128xf32> -> vector<2x128xf32>
    %c0_20 = arith.constant 0 : index
    %c0_21 = arith.constant 0 : index
    %36 = vector.load %arg5[%c0_20, %c0_21] : memref<1x128xf32, #tpu.memory_space<vmem>>, vector<1x128xf32>
    %c0_22 = arith.constant 0 : index
    %c0_23 = arith.constant 0 : index
    %37 = vector.load %arg6[%c0_22, %c0_23] : memref<1x128xf32, #tpu.memory_space<vmem>>, vector<1x128xf32>
    %cst_24 = arith.constant dense<0.000000e+00> : vector<128xf32>
    %38 = vector.multi_reduction <add>, %35, %cst_24 [0] : vector<2x128xf32> to vector<128xf32>
    %39 = vector.shape_cast %38 : vector<128xf32> to vector<1x128xf32>
    %cst_25 = arith.constant 2.000000e+00 : f32
    %40 = vector.broadcast %cst_25 : f32 to vector<1x128xf32>
    %41 = arith.divf %39, %40 : vector<1x128xf32>
    %42 = vector.broadcast %41 : vector<1x128xf32> to vector<2x128xf32>
    %43 = arith.subf %35, %42 : vector<2x128xf32>
    %44 = arith.mulf %43, %43 : vector<2x128xf32>
    %cst_26 = arith.constant dense<0.000000e+00> : vector<128xf32>
    %45 = vector.multi_reduction <add>, %44, %cst_26 [0] : vector<2x128xf32> to vector<128xf32>
    %46 = vector.shape_cast %45 : vector<128xf32> to vector<1x128xf32>
    %cst_27 = arith.constant 2.000000e+00 : f32
    %47 = vector.broadcast %cst_27 : f32 to vector<1x128xf32>
    %48 = arith.divf %46, %47 : vector<1x128xf32>
    %49 = vector.broadcast %41 : vector<1x128xf32> to vector<2x128xf32>
    %50 = arith.subf %35, %49 : vector<2x128xf32>
    %cst_28 = arith.constant 9.99999974E-6 : f32
    %51 = vector.broadcast %cst_28 : f32 to vector<1x128xf32>
    %52 = arith.addf %48, %51 : vector<1x128xf32>
    %53 = math.rsqrt %52 : vector<1x128xf32>
    %54 = vector.broadcast %53 : vector<1x128xf32> to vector<2x128xf32>
    %55 = arith.mulf %50, %54 : vector<2x128xf32>
    %56 = vector.broadcast %36 : vector<1x128xf32> to vector<2x128xf32>
    %57 = arith.mulf %55, %56 : vector<2x128xf32>
    %58 = vector.broadcast %37 : vector<1x128xf32> to vector<2x128xf32>
    %59 = arith.addf %57, %58 : vector<2x128xf32>
    %cst_29 = arith.constant 0.000000e+00 : f32
    %60 = vector.broadcast %cst_29 : f32 to vector<2x128xf32>
    %61 = arith.maximumf %59, %60 : vector<2x128xf32>
    %c0_30 = arith.constant 0 : index
    %c0_31 = arith.constant 0 : index
    %62 = vector.load %arg7[%c0_30, %c0_31] : memref<128x128xf32, #tpu.memory_space<vmem>>, vector<128x128xf32>
    %cst_32 = arith.constant dense<0.000000e+00> : vector<2x128xf32>
    %63 = tpu.matmul %61, %62, %cst_32 {dimension_numbers = #tpu.dot_dimension_numbers<[1], [0], [0], [1], [0, 0, 1, 1], [], []>} : vector<2x128xf32>, vector<128x128xf32>, vector<2x128xf32> -> vector<2x128xf32>
    %c0_33 = arith.constant 0 : index
    %c0_34 = arith.constant 0 : index
    %64 = vector.load %arg8[%c0_33, %c0_34] : memref<1x128xf32, #tpu.memory_space<vmem>>, vector<1x128xf32>
    %65 = vector.broadcast %64 : vector<1x128xf32> to vector<2x128xf32>
    %66 = arith.addf %63, %65 : vector<2x128xf32>
    %c0_35 = arith.constant 0 : index
    %c0_36 = arith.constant 0 : index
    %67 = vector.load %arg15[%c0_35, %c0_36] : memref<2x128xf32, #tpu.memory_space<vmem>>, vector<2x128xf32>
    tpu.vector_store %arg15[%c0_35, %c0_36], %66 {strides = array<i32>} : memref<2x128xf32, #tpu.memory_space<vmem>>, vector<2x128xf32>,
    %c0_37 = arith.constant 0 : index
    %c0_38 = arith.constant 0 : index
    %68 = vector.load %arg9[%c0_37, %c0_38] : memref<128x128xf32, #tpu.memory_space<vmem>>, vector<128x128xf32>
    %cst_39 = arith.constant dense<0.000000e+00> : vector<2x128xf32>
    %69 = tpu.matmul %66, %68, %cst_39 {dimension_numbers = #tpu.dot_dimension_numbers<[1], [0], [0], [1], [0, 0, 1, 1], [], []>} : vector<2x128xf32>, vector<128x128xf32>, vector<2x128xf32> -> vector<2x128xf32>
    %c0_40 = arith.constant 0 : index
    %c0_41 = arith.constant 0 : index
    %70 = vector.load %arg10[%c0_40, %c0_41] : memref<1x128xf32, #tpu.memory_space<vmem>>, vector<1x128xf32>
    %c0_42 = arith.constant 0 : index
    %c0_43 = arith.constant 0 : index
    %71 = vector.load %arg11[%c0_42, %c0_43] : memref<1x128xf32, #tpu.memory_space<vmem>>, vector<1x128xf32>
    %cst_44 = arith.constant dense<0.000000e+00> : vector<128xf32>
    %72 = vector.multi_reduction <add>, %69, %cst_44 [0] : vector<2x128xf32> to vector<128xf32>
    %73 = vector.shape_cast %72 : vector<128xf32> to vector<1x128xf32>
    %cst_45 = arith.constant 2.000000e+00 : f32
    %74 = vector.broadcast %cst_45 : f32 to vector<1x128xf32>
    %75 = arith.divf %73, %74 : vector<1x128xf32>
    %76 = vector.broadcast %75 : vector<1x128xf32> to vector<2x128xf32>
    %77 = arith.subf %69, %76 : vector<2x128xf32>
    %78 = arith.mulf %77, %77 : vector<2x128xf32>
    %cst_46 = arith.constant dense<0.000000e+00> : vector<128xf32>
    %79 = vector.multi_reduction <add>, %78, %cst_46 [0] : vector<2x128xf32> to vector<128xf32>
    %80 = vector.shape_cast %79 : vector<128xf32> to vector<1x128xf32>
    %cst_47 = arith.constant 2.000000e+00 : f32
    %81 = vector.broadcast %cst_47 : f32 to vector<1x128xf32>
    %82 = arith.divf %80, %81 : vector<1x128xf32>
    %83 = vector.broadcast %75 : vector<1x128xf32> to vector<2x128xf32>
    %84 = arith.subf %69, %83 : vector<2x128xf32>
    %cst_48 = arith.constant 9.99999974E-6 : f32
    %85 = vector.broadcast %cst_48 : f32 to vector<1x128xf32>
    %86 = arith.addf %82, %85 : vector<1x128xf32>
    %87 = math.rsqrt %86 : vector<1x128xf32>
    %88 = vector.broadcast %87 : vector<1x128xf32> to vector<2x128xf32>
    %89 = arith.mulf %84, %88 : vector<2x128xf32>
    %90 = vector.broadcast %70 : vector<1x128xf32> to vector<2x128xf32>
    %91 = arith.mulf %89, %90 : vector<2x128xf32>
    %92 = vector.broadcast %71 : vector<1x128xf32> to vector<2x128xf32>
    %93 = arith.addf %91, %92 : vector<2x128xf32>
    %cst_49 = arith.constant 0.000000e+00 : f32
    %94 = vector.broadcast %cst_49 : f32 to vector<2x128xf32>
    %95 = arith.maximumf %93, %94 : vector<2x128xf32>
    %c0_50 = arith.constant 0 : index
    %c0_51 = arith.constant 0 : index
    %96 = vector.load %arg12[%c0_50, %c0_51] : memref<128x128xf32, #tpu.memory_space<vmem>>, vector<128x128xf32>
    %cst_52 = arith.constant dense<0.000000e+00> : vector<2x128xf32>
    %97 = tpu.matmul %95, %96, %cst_52 {dimension_numbers = #tpu.dot_dimension_numbers<[1], [0], [0], [1], [0, 0, 1, 1], [], []>} : vector<2x128xf32>, vector<128x128xf32>, vector<2x128xf32> -> vector<2x128xf32>
    %c0_53 = arith.constant 0 : index
    %c0_54 = arith.constant 0 : index
    %98 = vector.load %arg13[%c0_53, %c0_54] : memref<1x128xf32, #tpu.memory_space<vmem>>, vector<1x128xf32>
    %99 = vector.broadcast %98 : vector<1x128xf32> to vector<2x128xf32>
    %100 = arith.addf %97, %99 : vector<2x128xf32>
    %c0_55 = arith.constant 0 : index
    %c0_56 = arith.constant 0 : index
    %101 = vector.load %arg16[%c0_55, %c0_56] : memref<2x128xf32, #tpu.memory_space<vmem>>, vector<2x128xf32>
    tpu.vector_store %arg16[%c0_55, %c0_56], %100 {strides = array<i32>} : memref<2x128xf32, #tpu.memory_space<vmem>>, vector<2x128xf32>,
    return
  }
}

</mosaic_0001>

<bundles_post_ra>
// kernel: byol_forward.1
= control target key start
LH: loop header
LB: loop body
LE: loop exit
PB: predicated region body
PF: predicated region fallthrough
CT: control target
= control target key end

     0   :  { %s2002_s0 = inlined_call_operand.vmem [shape: f32[128,256], index: 0, kind: input, shape index: {}]   ;;  %s2003_s1 = inlined_call_operand.vmem [shape: f32[256,128], index: 1, kind: input, shape index: {}]   ;;  %s2004_s2 = inlined_call_operand.vmem [shape: f32[1,128], index: 2, kind: input, shape index: {}]   ;;  %s2005_s3 = inlined_call_operand.vmem [shape: f32[1,128], index: 3, kind: input, shape index: {}]   ;;  %s2006_s4 = inlined_call_operand.vmem [shape: f32[128,128], index: 4, kind: input, shape index: {}]   ;;  %s2007_s5 = inlined_call_operand.vmem [shape: f32[1,128], index: 5, kind: input, shape index: {}]   ;;  %s2008_s6 = inlined_call_operand.vmem [shape: f32[1,128], index: 6, kind: input, shape index: {}]   ;;  %s2009_s7 = inlined_call_operand.vmem [shape: f32[128,128], index: 7, kind: input, shape index: {}]   ;;  %s2010_s8 = inlined_call_operand.vmem [shape: f32[1,128], index: 8, kind: input, shape index: {}]   ;;  %s2011_s9 = inlined_call_operand.vmem [shape: f32[128,128], index: 9, kind: input, shape index: {}]   ;;  %s2012_s10 = inlined_call_operand.vmem [shape: f32[1,128], index: 10, kind: input, shape index: {}]   ;;  %s2013_s11 = inlined_call_operand.vmem [shape: f32[1,128], index: 11, kind: input, shape index: {}]   ;;  %s2014_s12 = inlined_call_operand.vmem [shape: f32[128,128], index: 12, kind: input, shape index: {}]   ;;  %s2015_s13 = inlined_call_operand.vmem [shape: f32[1,128], index: 13, kind: input, shape index: {}]   ;;  %s2016_s14 = inlined_call_operand.hbm [shape: f32[2,128], index: 14, kind: output, shape index: {0}]   ;;  %s2017_s15 = inlined_call_operand.hbm [shape: f32[2,128], index: 15, kind: output, shape index: {1}]   ;;  %s2018_s16 = inlined_call_operand.hbm [shape: f32[2,128], index: 16, kind: output, shape index: {2}]  }
   0x1   :  { %2020 = sst [smem:[#allocation9_spill]] %s2002_s0 }
   0x2   :  { %22 = vsyncpa [#allocation3], 0  ;;  %v115_v0 = vld [vmem:[%s2003_s1 + $0xf8] sm:$0xff]  ;;  %v114_v2 = vld [vmem:[%s2003_s1 + $0xf0] sm:$0xff]  ;;  %s2021_s19 = sld [smem:[#allocation9_spill]] }
   0x3   :  { %v99_v1 = vld [vmem:[%s2003_s1 + $0x78] sm:$0xff]  ;;  %940 = vmatprep.subr.mxu0 %v115_v0  ;;  %v98_v3 = vld [vmem:[%s2003_s1 + $0x70] sm:$0xff]  ;;  %v113_v4 = vld [vmem:[%s2003_s1 + $0xe8] sm:$0xff] }
   0x4   :  { %941 = vmatpush3.msra.mxu0 %v99_v1  ;;  %v97_v5 = vld [vmem:[%s2003_s1 + $0x68] sm:$0xff]  ;;  %v112_v6 = vld [vmem:[%s2003_s1 + $0xe0] sm:$0xff]  ;;  %v111_v8 = vld [vmem:[%s2003_s1 + $0xd8] sm:$0xff] }
   0x5   :  { %942 = vmatprep.subr.mxu0 %v114_v2  ;;  %v96_v7 = vld [vmem:[%s2003_s1 + $0x60] sm:$0xff]  ;;  %v95_v9 = vld [vmem:[%s2003_s1 + $0x58] sm:$0xff]  ;;  %v110_v10 = vld [vmem:[%s2003_s1 + $0xd0] sm:$0xff] }
   0x6   :  { %943 = vmatpush3.msra.mxu0 %v98_v3  ;;  %v94_v11 = vld [vmem:[%s2003_s1 + $0x50] sm:$0xff]  ;;  %v109_v12 = vld [vmem:[%s2003_s1 + $0xc8] sm:$0xff]  ;;  %v108_v15 = vld [vmem:[%s2003_s1 + $0xc0] sm:$0xff] }
   0x7   :  { %944 = vmatprep.subr.mxu0 %v113_v4  ;;  %v93_v14 = vld [vmem:[%s2003_s1 + $0x48] sm:$0xff]  ;;  %v92_v16 = vld [vmem:[%s2003_s1 + $0x40] sm:$0xff]  ;;  %v107_v17 = vld [vmem:[%s2003_s1 + $0xb8] sm:$0xff] }
   0x8   :  { %945 = vmatpush3.msra.mxu0 %v97_v5  ;;  %v53_v13 = vld [vmem:[%s2021_s19 + $0x8] sm:$0xff]  ;;  %v91_v18 = vld [vmem:[%s2003_s1 + $0x38] sm:$0xff]  ;;  %v106_v19 = vld [vmem:[%s2003_s1 + $0xb0] sm:$0xff] }
   0x9   :  { %946 = vmatprep.subr.mxu0 %v112_v6  ;;  %180 = vmatprep.mubr.f32.mxu0 %v53_v13  ;;  %v90_v20 = vld [vmem:[%s2003_s1 + $0x30] sm:$0xff]  ;;  %v105_v21 = vld [vmem:[%s2003_s1 + $0xa8] sm:$0xff]  ;;  %v104_v23 = vld [vmem:[%s2003_s1 + $0xa0] sm:$0xff] }
   0xa   :  { %947 = vmatpush3.msra.mxu0 %v96_v7  ;;  %v89_v22 = vld [vmem:[%s2003_s1 + $0x28] sm:$0xff]  ;;  %v88_v24 = vld [vmem:[%s2003_s1 + $0x20] sm:$0xff] }
   0xb   :  { %948 = vmatprep.subr.mxu0 %v111_v8 }
   0xc   :  { %949 = vmatpush3.msra.mxu0 %v95_v9 }
   0xd   :  { %950 = vmatprep.subr.mxu0 %v110_v10 }
   0xe   :  { %951 = vmatpush3.msra.mxu0 %v94_v11 }
   0xf   :  { %952 = vmatprep.subr.mxu0 %v109_v12 }
  0x10   :  { %953 = vmatpush3.msra.mxu0 %v93_v14 }
  0x11   :  { %954 = vmatprep.subr.mxu0 %v108_v15 }
  0x12   :  { %955 = vmatpush3.msra.mxu0 %v92_v16 }
  0x13   :  { %956 = vmatprep.subr.mxu0 %v107_v17 }
  0x14   :  { %957 = vmatpush3.msra.mxu0 %v91_v18 }
  0x15   :  { %958 = vmatprep.subr.mxu0 %v106_v19 }
  0x16   :  { %959 = vmatpush3.msra.mxu0 %v90_v20 }
  0x17   :  { %960 = vmatprep.subr.mxu0 %v105_v21 }
  0x18   :  { %23 = vsyncpa [#allocation5], 0  ;;  %961 = vmatpush3.msra.mxu0 %v89_v22  ;;  %v103_v25 = vld [vmem:[%s2003_s1 + $0x98] sm:$0xff]  ;;  %v102_v27 = vld [vmem:[%s2003_s1 + $0x90] sm:$0xff]  ;;  %v1303_v14 = vmov 0.0   ;;  %vm1304_vm0 = vmmov 0  }
  0x19   :  { %962 = vmatprep.subr.mxu0 %v104_v23  ;;  %v87_v26 = vld [vmem:[%s2003_s1 + $0x18] sm:$0xff]  ;;  %v86_v28 = vld [vmem:[%s2003_s1 + $0x10] sm:$0xff]  ;;  %v101_v29 = vld [vmem:[%s2003_s1 + $0x88] sm:$0xff]  ;;  %1088 = vmatprep.subr.mxu1 %v1303_v14  ;;  %vm449_vm1 = vcmask 1041409   ;;  %vm541_vm2 = vcmask 1041408   ;;  %s1305_s18 = smov [#allocation4]  }
  0x1a   :  { %963 = vmatpush3.msra.mxu0 %v88_v24  ;;  %v85_v30 = vld [vmem:[%s2003_s1 + $0x8] sm:$0xff]  ;;  %v100_v31 = vld [vmem:[%s2003_s1 + $0x80] sm:$0xff]  ;;  %v55_v34 = vld [vmem:[%s2021_s19 + $0x18] sm:$0xff]  ;;  %1120 = vmatprep.mubr.msk.f32.mxu1 %vm1304_vm0, %v1303_v14 }
  0x1b   :  { %964 = vmatprep.subr.mxu0 %v103_v25  ;;  %v84_v32 = vld [vmem:[%s2003_s1] sm:$0xff]  ;;  %v54_v35 = vld [vmem:[%s2021_s19 + $0x10] sm:$0xff]  ;;  %v57_v36 = vld [vmem:[%s2021_s19 + $0x28] sm:$0xff] }
  0x1c   :  { %965 = vmatpush3.msra.mxu0 %v87_v26  ;;  %v52_v33 = vld [vmem:[%s2021_s19] sm:$0xff]  ;;  %v59_v38 = vld [vmem:[%s2021_s19 + $0x38] sm:$0xff]  ;;  %v58_v39 = vld [vmem:[%s2021_s19 + $0x30] sm:$0xff] }
  0x1d   :  { %966 = vmatprep.subr.mxu0 %v102_v27  ;;  %v56_v37 = vld [vmem:[%s2021_s19 + $0x20] sm:$0xff]  ;;  %v61_v40 = vld [vmem:[%s2021_s19 + $0x48] sm:$0xff]  ;;  %v63_v42 = vld [vmem:[%s2021_s19 + $0x58] sm:$0xff] }
  0x1e   :  { %967 = vmatpush3.msra.mxu0 %v86_v28  ;;  %v60_v41 = vld [vmem:[%s2021_s19 + $0x40] sm:$0xff]  ;;  %v62_v43 = vld [vmem:[%s2021_s19 + $0x50] sm:$0xff]  ;;  %v65_v44 = vld [vmem:[%s2021_s19 + $0x68] sm:$0xff] }
  0x1f   :  { %968 = vmatprep.subr.mxu0 %v101_v29  ;;  %v64_v45 = vld [vmem:[%s2021_s19 + $0x60] sm:$0xff]  ;;  %v67_v46 = vld [vmem:[%s2021_s19 + $0x78] sm:$0xff]  ;;  %v66_v47 = vld [vmem:[%s2021_s19 + $0x70] sm:$0xff] }
  0x20   :  { %969 = vmatpush3.msra.mxu0 %v85_v30  ;;  %v69_v48 = vld [vmem:[%s2021_s19 + $0x88] sm:$0xff]  ;;  %v68_v49 = vld [vmem:[%s2021_s19 + $0x80] sm:$0xff]  ;;  %v71_v50 = vld [vmem:[%s2021_s19 + $0x98] sm:$0xff] }
  0x21   :  { %970 = vmatprep.subr.mxu0 %v100_v31  ;;  %v70_v51 = vld [vmem:[%s2021_s19 + $0x90] sm:$0xff]  ;;  %v73_v52 = vld [vmem:[%s2021_s19 + $0xa8] sm:$0xff]  ;;  %v72_v53 = vld [vmem:[%s2021_s19 + $0xa0] sm:$0xff] }
  0x22   :  { %971 = vmatpush3.msra.mxu0 %v84_v32  ;;  %v75_v54 = vld [vmem:[%s2021_s19 + $0xb8] sm:$0xff]  ;;  %v74_v55 = vld [vmem:[%s2021_s19 + $0xb0] sm:$0xff]  ;;  %v77_v56 = vld [vmem:[%s2021_s19 + $0xc8] sm:$0xff] }
  0x23   :  { %181 = vmatmul.mubr.f32.vlgmr.msra.gmra.mxu0 %v52_v33  ;;  %v76_v57 = vld [vmem:[%s2021_s19 + $0xc0] sm:$0xff]  ;;  %v79_v58 = vld [vmem:[%s2021_s19 + $0xd8] sm:$0xff]  ;;  %v78_v59 = vld [vmem:[%s2021_s19 + $0xd0] sm:$0xff]  ;;  %1158 = vmatprep.subr.mxu0 %v1303_v14 }
  0x24   :  { %185 = vmatprep.mubr.f32.mxu0 %v55_v34  ;;  %v81_v60 = vld [vmem:[%s2021_s19 + $0xe8] sm:$0xff]  ;;  %v80_v61 = vld [vmem:[%s2021_s19 + $0xe0] sm:$0xff]  ;;  %v83_v62 = vld [vmem:[%s2021_s19 + $0xf8] sm:$0xff] }
  0x25   :  { %v82_v63 = vld [vmem:[%s2021_s19 + $0xf0] sm:$0xff]  ;;  %v468_v15 = vld [vmem:[%s2006_s4 + $0x78] sm:$0xff]  ;;  %v466_v19 = vld [vmem:[%s2006_s4 + $0x68] sm:$0xff] }
  0x26   :  { %1089 = vmatpush3.msra.mxu1 %v468_v15  ;;  %v467_v17 = vld [vmem:[%s2006_s4 + $0x70] sm:$0xff]  ;;  %v465_v22 = vld [vmem:[%s2006_s4 + $0x60] sm:$0xff]  ;;  %v464_v26 = vld [vmem:[%s2006_s4 + $0x58] sm:$0xff] }
  0x27   :  { %186 = vmatmul.mubr.f32.gmra.mxu0 %v54_v35  ;;  %1090 = vmatprep.subr.mxu1 %v1303_v14  ;;  %v463_v30 = vld [vmem:[%s2006_s4 + $0x50] sm:$0xff]  ;;  %v462_v34 = vld [vmem:[%s2006_s4 + $0x48] sm:$0xff] }
  0x28   :  { %190 = vmatprep.mubr.f32.mxu0 %v57_v36  ;;  %1091 = vmatpush3.msra.mxu1 %v467_v17 }
  0x29   :  { %1092 = vmatprep.subr.mxu1 %v1303_v14 }
  0x2a   :  { %1093 = vmatpush3.msra.mxu1 %v466_v19 }
  0x2b   :  { %191 = vmatmul.mubr.f32.gmra.mxu0 %v56_v37  ;;  %1094 = vmatprep.subr.mxu1 %v1303_v14 }
  0x2c   :  { %195 = vmatprep.mubr.f32.mxu0 %v59_v38  ;;  %1095 = vmatpush3.msra.mxu1 %v465_v22  ;;  %v461_v38 = vld [vmem:[%s2006_s4 + $0x40] sm:$0xff] }
  0x2d   :  { %1096 = vmatprep.subr.mxu1 %v1303_v14 }
  0x2e   :  { %1097 = vmatpush3.msra.mxu1 %v464_v26 }
  0x2f   :  { %196 = vmatmul.mubr.f32.gmra.mxu0 %v58_v39  ;;  %1098 = vmatprep.subr.mxu1 %v1303_v14  ;;  %v460_v39 = vld [vmem:[%s2006_s4 + $0x38] sm:$0xff] }
  0x30   :  { %200 = vmatprep.mubr.f32.mxu0 %v61_v40  ;;  %1099 = vmatpush3.msra.mxu1 %v463_v30 }
  0x31   :  { %1100 = vmatprep.subr.mxu1 %v1303_v14 }
  0x32   :  { %1101 = vmatpush3.msra.mxu1 %v462_v34 }
  0x33   :  { %201 = vmatmul.mubr.f32.gmra.mxu0 %v60_v41  ;;  %1102 = vmatprep.subr.mxu1 %v1303_v14 }
  0x34   :  { %205 = vmatprep.mubr.f32.mxu0 %v63_v42  ;;  %1103 = vmatpush3.msra.mxu1 %v461_v38 }
  0x35   :  { %1104 = vmatprep.subr.mxu1 %v1303_v14 }
  0x36   :  { %1105 = vmatpush3.msra.mxu1 %v460_v39 }
  0x37   :  { %206 = vmatmul.mubr.f32.gmra.mxu0 %v62_v43  ;;  %v459_v43 = vld [vmem:[%s2006_s4 + $0x30] sm:$0xff]  ;;  %1106 = vmatprep.subr.mxu1 %v1303_v14 }
  0x38   :  { %210 = vmatprep.mubr.f32.mxu0 %v65_v44  ;;  %1107 = vmatpush3.msra.mxu1 %v459_v43 }
  0x39   :  { %1108 = vmatprep.subr.mxu1 %v1303_v14 }
  0x3b   :  { %211 = vmatmul.mubr.f32.gmra.mxu0 %v64_v45 }
  0x3c   :  { %215 = vmatprep.mubr.f32.mxu0 %v67_v46 }
  0x3f   :  { %216 = vmatmul.mubr.f32.gmra.mxu0 %v66_v47  ;;  %v458_v47 = vld [vmem:[%s2006_s4 + $0x28] sm:$0xff] }
  0x40   :  { %220 = vmatprep.mubr.f32.mxu0 %v69_v48  ;;  %1109 = vmatpush3.msra.mxu1 %v458_v47 }
  0x41   :  { %1110 = vmatprep.subr.mxu1 %v1303_v14 }
  0x43   :  { %221 = vmatmul.mubr.f32.gmra.mxu0 %v68_v49 }
  0x44   :  { %225 = vmatprep.mubr.f32.mxu0 %v71_v50 }
  0x47   :  { %226 = vmatmul.mubr.f32.gmra.mxu0 %v70_v51  ;;  %v457_v51 = vld [vmem:[%s2006_s4 + $0x20] sm:$0xff] }
  0x48   :  { %230 = vmatprep.mubr.f32.mxu0 %v73_v52  ;;  %1111 = vmatpush3.msra.mxu1 %v457_v51 }
  0x49   :  { %1112 = vmatprep.subr.mxu1 %v1303_v14 }
  0x4b   :  { %231 = vmatmul.mubr.f32.gmra.mxu0 %v72_v53 }
  0x4c   :  { %235 = vmatprep.mubr.f32.mxu0 %v75_v54 }
  0x4f   :  { %236 = vmatmul.mubr.f32.gmra.mxu0 %v74_v55  ;;  %v456_v55 = vld [vmem:[%s2006_s4 + $0x18] sm:$0xff] }
  0x50   :  { %240 = vmatprep.mubr.f32.mxu0 %v77_v56  ;;  %1113 = vmatpush3.msra.mxu1 %v456_v55 }
  0x51   :  { %1114 = vmatprep.subr.mxu1 %v1303_v14 }
  0x53   :  { %241 = vmatmul.mubr.f32.gmra.mxu0 %v76_v57 }
  0x54   :  { %245 = vmatprep.mubr.f32.mxu0 %v79_v58 }
  0x57   :  { %246 = vmatmul.mubr.f32.gmra.mxu0 %v78_v59  ;;  %v455_v59 = vld [vmem:[%s2006_s4 + $0x10] sm:$0xff] }
  0x58   :  { %250 = vmatprep.mubr.f32.mxu0 %v81_v60  ;;  %1115 = vmatpush3.msra.mxu1 %v455_v59 }
  0x59   :  { %1116 = vmatprep.subr.mxu1 %v1303_v14 }
  0x5b   :  { %251 = vmatmul.mubr.f32.gmra.mxu0 %v80_v61 }
  0x5c   :  { %255 = vmatprep.mubr.f32.mxu0 %v83_v62 }
  0x5f   :  { %256 = vmatmul.mubr.f32.gmra.mxu0 %v82_v63  ;;  %v454_v63 = vld [vmem:[%s2006_s4 + $0x8] sm:$0xff] }
  0x60   :  { %1190 = vmatprep.mubr.msk.f32.mxu0 %vm1304_vm0, %v1303_v14  ;;  %1117 = vmatpush3.msra.mxu1 %v454_v63 }
  0x61   :  { %1118 = vmatprep.subr.mxu1 %v1303_v14 }
  0xe3   :  { %v972_v0 = vpop.f32.mrf.mxu0 }
  0xe5   :  { %v973_v1 = vpop.f32.mrf.mxu0 }
  0xe6   :  { %v1604_v24 = vadd.f32 %v973_v1, %v972_v0 }
  0xe7   :  { %v975_v2 = vpop.f32.mrf.mxu0 }
  0xe9   :  { %v976_v3 = vpop.f32.mrf.mxu0 }
  0xea   :  { %v1598_v21 = vadd.f32 %v976_v3, %v975_v2  ;;  %v453_v3 = vld [vmem:[%s2006_s4] sm:$0xff] }
  0xeb   :  { %v978_v4 = vpop.f32.mrf.mxu0  ;;  %1119 = vmatpush3.msra.mxu1 %v453_v3 }
  0xec   :  { %v263_v28 = vadd.f32 %v1598_v21, %v1604_v24  ;;  %1123 = vmatprep.subr.mxu1 %v1303_v14 }
  0xed   :  { %v979_v5 = vpop.f32.mrf.mxu0 }
  0xee   :  { %v1606_v25 = vadd.f32 %v979_v5, %v978_v4 }
  0xef   :  { %v981_v6 = vpop.f32.mrf.mxu0 }
  0xf0   :  { %v264_v32 = vadd.f32 %v1606_v25, %v263_v28 }
  0xf1   :  { %v982_v7 = vpop.f32.mrf.mxu0 }
  0xf2   :  { %v1614_v29 = vadd.f32 %v982_v7, %v981_v6 }
  0xf3   :  { %v984_v8 = vpop.f32.mrf.mxu0 }
  0xf4   :  { %v265_v36 = vadd.f32 %v1614_v29, %v264_v32 }
  0xf5   :  { %v985_v9 = vpop.f32.mrf.mxu0 }
  0xf6   :  { %v1621_v33 = vadd.f32 %v985_v9, %v984_v8 }
  0xf7   :  { %v987_v10 = vpop.f32.mrf.mxu0 }
  0xf8   :  { %v266_v41 = vadd.f32 %v1621_v33, %v265_v36 }
  0xf9   :  { %v988_v11 = vpop.f32.mrf.mxu0 }
  0xfa   :  { %v1628_v37 = vadd.f32 %v988_v11, %v987_v10 }
  0xfb   :  { %v990_v12 = vpop.f32.mrf.mxu0 }
  0xfc   :  { %v267_v45 = vadd.f32 %v1628_v37, %v266_v41 }
  0xfd   :  { %v991_v13 = vpop.f32.mrf.mxu0 }
  0xfe   :  { %v1640_v42 = vadd.f32 %v991_v13, %v990_v12 }
  0xff   :  { %v993_v16 = vpop.f32.mrf.mxu0 }
 0x100   :  { %v268_v49 = vadd.f32 %v1640_v42, %v267_v45 }
 0x101   :  { %v994_v18 = vpop.f32.mrf.mxu0 }
 0x102   :  { %v1649_v46 = vadd.f32 %v994_v18, %v993_v16 }
 0x103   :  { %v996_v20 = vpop.f32.mrf.mxu0 }
 0x104   :  { %v269_v53 = vadd.f32 %v1649_v46, %v268_v49 }
 0x105   :  { %v997_v23 = vpop.f32.mrf.mxu0 }
 0x106   :  { %v1656_v50 = vadd.f32 %v997_v23, %v996_v20 }
 0x107   :  { %v999_v27 = vpop.f32.mrf.mxu0 }
 0x108   :  { %v270_v57 = vadd.f32 %v1656_v50, %v269_v53 }
 0x109   :  { %v1000_v31 = vpop.f32.mrf.mxu0 }
 0x10a   :  { %v1663_v54 = vadd.f32 %v1000_v31, %v999_v27 }
 0x10b   :  { %v1002_v35 = vpop.f32.mrf.mxu0 }
 0x10c   :  { %v271_v61 = vadd.f32 %v1663_v54, %v270_v57 }
 0x10d   :  { %v1003_v40 = vpop.f32.mrf.mxu0 }
 0x10e   :  { %v1004_v58 = vadd.f32 %v1003_v40, %v1002_v35 }
 0x10f   :  { %v1005_v44 = vpop.f32.mrf.mxu0 }
 0x110   :  { %v272_v1 = vadd.f32 %v1004_v58, %v271_v61 }
 0x111   :  { %v1006_v48 = vpop.f32.mrf.mxu0 }
 0x112   :  { %v1007_v62 = vadd.f32 %v1006_v48, %v1005_v44 }
 0x113   :  { %v1008_v52 = vpop.f32.mrf.mxu0 }
 0x114   :  { %v273_v5 = vadd.f32 %v1007_v62, %v272_v1 }
 0x115   :  { %v1009_v56 = vpop.f32.mrf.mxu0 }
 0x116   :  { %v1010_v2 = vadd.f32 %v1009_v56, %v1008_v52 }
 0x117   :  { %v1011_v60 = vpop.f32.mrf.mxu0 }
 0x118   :  { %v274_v8 = vadd.f32 %v1010_v2, %v273_v5 }
 0x119   :  { %v1012_v0 = vpop.f32.mrf.mxu0 }
 0x11a   :  { %v1013_v6 = vadd.f32 %v1012_v0, %v1011_v60 }
 0x11b   :  { %v1014_v4 = vpop.f32.mrf.mxu0 }
 0x11c   :  { %v275_v11 = vadd.f32 %v1013_v6, %v274_v8 }
 0x11d   :  { %v1015_v7 = vpop.f32.mrf.mxu0 }
 0x11e   :  { %v1016_v9 = vadd.f32 %v1015_v7, %v1014_v4 }
 0x11f   :  { %v1017_v10 = vpop.f32.mrf.mxu0 }
 0x120   :  { %v276_v13 = vadd.f32 %v1016_v9, %v275_v11 }
 0x121   :  { %v1018_v12 = vpop.f32.mrf.mxu0 }
 0x122   :  { %v1019_v15 = vadd.f32 %v1018_v12, %v1017_v10 }
 0x124   :  { %v277_v16 = vadd.f32 %v1019_v15, %v276_v13 }
 0x126   :  { %v278_v17 = vrot.slane %v277_v16, 4 }
 0x128   :  { %v279_v18 = vadd.f32 %v278_v17, %v277_v16 }
 0x12a   :  { %v280_v19 = vrot.slane %v279_v18, 2 }
 0x12c   :  { %v281_v20 = vadd.f32 %v280_v19, %v279_v18 }
 0x12e   :  { %v282_v22 = vrot.slane %v281_v20, 1 }
 0x130   :  { %v283_v23 = vadd.f32 %v282_v22, %v281_v20 }
 0x132   :  { %v285_v26 = vmul.f32 0.0078125, %v283_v23  ;;  %v1735_v23 = vld [vmem:[%s2005_s3] ss:$0 sm:$0xff] }
 0x134   :  { %v1686_v27 = vsub.f32 %v1604_v24, %v285_v26  ;;  %v1689_v28 = vsub.f32 %v1598_v21, %v285_v26  ;;  %v1692_v30 = vsub.f32 %v1606_v25, %v285_v26  ;;  %v1699_v34 = vsub.f32 %v1614_v29, %v285_v26 }
 0x135   :  { %v1702_v35 = vsub.f32 %v1621_v33, %v285_v26  ;;  %v1707_v36 = vsub.f32 %v1628_v37, %v285_v26  ;;  %v1712_v39 = vsub.f32 %v1640_v42, %v285_v26  ;;  %v1717_v33 = vsub.f32 %v1649_v46, %v285_v26 }
 0x136   :  { %v302_v31 = vmul.f32 %v1686_v27, %v1686_v27  ;;  %v303_v32 = vmul.f32 %v1689_v28, %v1689_v28  ;;  %v304_v24 = vmul.f32 %v1692_v30, %v1692_v30  ;;  %v305_v25 = vmul.f32 %v1699_v34, %v1699_v34 }
 0x137   :  { %v306_v29 = vmul.f32 %v1702_v35, %v1702_v35  ;;  %v307_v41 = vmul.f32 %v1707_v36, %v1707_v36  ;;  %v294_v37 = vsub.f32 %v1656_v50, %v285_v26  ;;  %v308_v44 = vmul.f32 %v1712_v39, %v1712_v39 }
 0x138   :  { %v318_v21 = vadd.f32 %v303_v32, %v302_v31  ;;  %v295_v42 = vsub.f32 %v1663_v54, %v285_v26  ;;  %v309_v47 = vmul.f32 %v1717_v33, %v1717_v33  ;;  %v296_v49 = vsub.f32 %v1004_v58, %v285_v26 }
 0x139   :  { %v310_v51 = vmul.f32 %v294_v37, %v294_v37  ;;  %v297_v52 = vsub.f32 %v1007_v62, %v285_v26  ;;  %v298_v56 = vsub.f32 %v1010_v2, %v285_v26  ;;  %v299_v50 = vsub.f32 %v1013_v6, %v285_v26 }
 0x13a   :  { %v319_v38 = vadd.f32 %v318_v21, %v304_v24  ;;  %v311_v53 = vmul.f32 %v295_v42, %v295_v42  ;;  %v312_v57 = vmul.f32 %v296_v49, %v296_v49  ;;  %v300_v63 = vsub.f32 %v1016_v9, %v285_v26 }
 0x13b   :  { %v313_v60 = vmul.f32 %v297_v52, %v297_v52  ;;  %v314_v0 = vmul.f32 %v298_v56, %v298_v56  ;;  %v301_v54 = vsub.f32 %v1019_v15, %v285_v26  ;;  %v315_v3 = vmul.f32 %v299_v50, %v299_v50  ;;  %v1730_v15 = vld [vmem:[%s2004_s2] ss:$0 sm:$0xff]  ;;  %s1306_s2 = smov [#allocation2]  }
 0x13c   :  { %v320_v40 = vadd.f32 %v319_v38, %v305_v25  ;;  %v316_v5 = vmul.f32 %v300_v63, %v300_v63  ;;  %s897_s3 = sshll.u32 %s1306_s2, 4  ;;  %s898_s3 = int_to_ptr.vmem [resolvable:$true] %s897_s3 }
 0x13d   :  { %v317_v58 = vmul.f32 %v301_v54, %v301_v54 }
 0x13e   :  { %v321_v43 = vadd.f32 %v320_v40, %v306_v29 }
 0x140   :  { %v322_v45 = vadd.f32 %v321_v43, %v307_v41 }
 0x142   :  { %v323_v48 = vadd.f32 %v322_v45, %v308_v44 }
 0x144   :  { %v324_v46 = vadd.f32 %v323_v48, %v309_v47 }
 0x146   :  { %v325_v55 = vadd.f32 %v324_v46, %v310_v51 }
 0x148   :  { %v326_v59 = vadd.f32 %v325_v55, %v311_v53 }
 0x14a   :  { %v327_v61 = vadd.f32 %v326_v59, %v312_v57 }
 0x14c   :  { %v328_v1 = vadd.f32 %v327_v61, %v313_v60 }
 0x14e   :  { %v329_v4 = vadd.f32 %v328_v1, %v314_v0 }
 0x150   :  { %v330_v7 = vadd.f32 %v329_v4, %v315_v3 }
 0x152   :  { %v331_v8 = vadd.f32 %v330_v7, %v316_v5 }
 0x154   :  { %v332_v10 = vadd.f32 %v331_v8, %v317_v58 }
 0x156   :  { %v333_v62 = vrot.slane %v332_v10, 4 }
 0x158   :  { %v334_v11 = vadd.f32 %v333_v62, %v332_v10 }
 0x15a   :  { %v335_v12 = vrot.slane %v334_v11, 2 }
 0x15c   :  { %v336_v2 = vadd.f32 %v335_v12, %v334_v11 }
 0x15e   :  { %v337_v13 = vrot.slane %v336_v2, 1 }
 0x160   :  { %v338_v16 = vadd.f32 %v337_v13, %v336_v2 }
 0x162   :  { %v339_v6 = vmul.f32 0.0078125, %v338_v16 }
 0x164   :  { %v340_v17 = vadd.f32 1e-05, %v339_v6 }
 0x166   :  { %1233 = vrsqrt.f32 %v340_v17 }
 0x173   :  { %v1234_v9 = vpop.eup %1233 }
 0x174   :  { %v350_v18 = vmul.f32 %v1234_v9, %v294_v37  ;;  %v351_v19 = vmul.f32 %v1234_v9, %v295_v42  ;;  %v352_v20 = vmul.f32 %v1234_v9, %v296_v49  ;;  %v353_v22 = vmul.f32 %v1234_v9, %v297_v52 }
 0x175   :  { %v354_v26 = vmul.f32 %v1234_v9, %v298_v56  ;;  %v355_v31 = vmul.f32 %v1234_v9, %v299_v50  ;;  %v356_v38 = vmul.f32 %v1234_v9, %v300_v63  ;;  %v357_v37 = vmul.f32 %v1234_v9, %v301_v54 }
 0x176   :  { %v372_v32 = vmul.f32 %v1730_v15, %v350_v18  ;;  %v373_v24 = vmul.f32 %v1730_v15, %v351_v19  ;;  %v374_v21 = vmul.f32 %v1730_v15, %v352_v20  ;;  %v375_v25 = vmul.f32 %v1730_v15, %v353_v22 }
 0x177   :  { %v376_v29 = vmul.f32 %v1730_v15, %v354_v26  ;;  %v377_v44 = vmul.f32 %v1730_v15, %v355_v31  ;;  %v378_v48 = vmul.f32 %v1730_v15, %v356_v38  ;;  %v342_v52 = vmul.f32 %v1234_v9, %v1686_v27 }
 0x178   :  { %v394_v40 = vadd.f32 %v1735_v23, %v372_v32  ;;  %v395_v41 = vadd.f32 %v1735_v23, %v373_v24  ;;  %v396_v43 = vadd.f32 %v1735_v23, %v374_v21  ;;  %v397_v45 = vadd.f32 %v1735_v23, %v375_v25 }
 0x179   :  { %v398_v49 = vadd.f32 %v1735_v23, %v376_v29  ;;  %v343_v53 = vmul.f32 %v1234_v9, %v1689_v28  ;;  %v344_v55 = vmul.f32 %v1234_v9, %v1692_v30  ;;  %v379_v56 = vmul.f32 %v1730_v15, %v357_v37 }
 0x17a   :  { %v410_v42 = vmax.f32 %v394_v40, 0.0  ;;  %v411_v47 = vmax.f32 %v395_v41, 0.0  ;;  %v412_v51 = vmax.f32 %v396_v43, 0.0  ;;  %v399_v57 = vadd.f32 %v1735_v23, %v377_v44 }
 0x17b   :  { %v345_v59 = vmul.f32 %v1234_v9, %v1699_v34  ;;  %v346_v50 = vmul.f32 %v1234_v9, %v1702_v35  ;;  %v413_v60 = vmax.f32 %v397_v45, 0.0  ;;  %v364_v63 = vmul.f32 %v1730_v15, %v342_v52 }
 0x17c   :  { %v431_v46 = vadd.f32 %v411_v47, %v410_v42  ;;  %v365_v0 = vmul.f32 %v1730_v15, %v343_v53  ;;  %v347_v27 = vmul.f32 %v1234_v9, %v1707_v36  ;;  %v366_v28 = vmul.f32 %v1730_v15, %v344_v55 }
 0x17d   :  { %v367_v30 = vmul.f32 %v1730_v15, %v345_v59  ;;  %v400_v1 = vadd.f32 %v1735_v23, %v378_v48  ;;  %v414_v54 = vmax.f32 %v398_v49, 0.0  ;;  %v386_v34 = vadd.f32 %v1735_v23, %v364_v63  ;;  %v591_v63 = vld [vmem:[%s2009_s7 + $0x60] sm:$0xff] }
 0x17e   :  { %v432_v61 = vadd.f32 %v431_v46, %v412_v51  ;;  %v348_v35 = vmul.f32 %v1234_v9, %v1712_v39  ;;  %v368_v4 = vmul.f32 %v1730_v15, %v346_v50  ;;  %v387_v5 = vadd.f32 %v1735_v23, %v365_v0  ;;  %v594_v50 = vld [vmem:[%s2009_s7 + $0x78] sm:$0xff] }
 0x17f   :  { %v388_v7 = vadd.f32 %v1735_v23, %v366_v28  ;;  %v401_v36 = vadd.f32 %v1735_v23, %v379_v56  ;;  %v415_v58 = vmax.f32 %v399_v57, 0.0  ;;  %v349_v10 = vmul.f32 %v1234_v9, %v1717_v33  ;;  %v590_v0 = vld [vmem:[%s2009_s7 + $0x58] sm:$0xff]  ;;  %v588_v28 = vld [vmem:[%s2009_s7 + $0x48] sm:$0xff] }
 0x180   :  { %v433_v3 = vadd.f32 %v432_v61, %v413_v60  ;;  %v369_v62 = vmul.f32 %v1730_v15, %v347_v27  ;;  %v389_v11 = vadd.f32 %v1735_v23, %v367_v30  ;;  %v402_v12 = vmax.f32 %v386_v34, 0.0  ;;  %v593_v60 = vld [vmem:[%s2009_s7 + $0x70] sm:$0xff]  ;;  %v592_v61 = vld [vmem:[%s2009_s7 + $0x68] sm:$0xff]  ;;  %v587_v30 = vld [vmem:[%s2009_s7 + $0x40] sm:$0xff] }
 0x181   :  { %v403_v2 = vmax.f32 %v387_v5, 0.0  ;;  %v416_v13 = vmax.f32 %v400_v1, 0.0  ;;  %v370_v16 = vmul.f32 %v1730_v15, %v348_v35  ;;  %v390_v6 = vadd.f32 %v1735_v23, %v368_v4  ;;  %v589_v27 = vld [vmem:[%s2009_s7 + $0x50] sm:$0xff]  ;;  %v586_v1 = vld [vmem:[%s2009_s7 + $0x38] sm:$0xff]  ;;  %v583_v34 = vld [vmem:[%s2009_s7 + $0x20] sm:$0xff] }
 0x182   :  { %v434_v8 = vadd.f32 %v433_v3, %v414_v54  ;;  %v404_v17 = vmax.f32 %v388_v7, 0.0  ;;  %v417_v19 = vmax.f32 %v401_v36, 0.0  ;;  %v371_v22 = vmul.f32 %v1730_v15, %v349_v10  ;;  %v585_v54 = vld [vmem:[%s2009_s7 + $0x30] sm:$0xff]  ;;  %v584_v3 = vld [vmem:[%s2009_s7 + $0x28] sm:$0xff]  ;;  %v582_v35 = vld [vmem:[%s2009_s7 + $0x18] sm:$0xff] }
 0x183   :  { %v418_v18 = vadd.f32 %v403_v2, %v402_v12  ;;  %v391_v33 = vadd.f32 %v1735_v23, %v369_v62  ;;  %v405_v9 = vmax.f32 %v389_v11, 0.0  ;;  %v392_v32 = vadd.f32 %v1735_v23, %v370_v16  ;;  %v581_v4 = vld [vmem:[%s2009_s7 + $0x10] sm:$0xff]  ;;  %v580_v5 = vld [vmem:[%s2009_s7 + $0x8] sm:$0xff]  ;;  %v579_v7 = vld [vmem:[%s2009_s7] sm:$0xff]  ;;  %s907_s7 = sshll.u32 %s1305_s18, 4  ;;  %s908_s7 = int_to_ptr.vmem [resolvable:$true] %s907_s7 }
 0x184   :  { %v435_v39 = vadd.f32 %v434_v8, %v415_v58  ;;  %v406_v24 = vmax.f32 %v390_v6, 0.0  ;;  %v393_v38 = vadd.f32 %v1735_v23, %v371_v22  ;;  %v688_v36 = vld [vmem:[%s2011_s9 + $0x78] sm:$0xff]  ;;  %v687_v58 = vld [vmem:[%s2011_s9 + $0x70] sm:$0xff]  ;;  %v686_v8 = vld [vmem:[%s2011_s9 + $0x68] sm:$0xff]  ;;  %s1239_s20 = scalar_lea.vmem %s908_s7, 32  ;;  %p1244_p1 = scmp.lt.s32.totalorder %s908_s7, %s908_s7 }
 0x185   :  { %v419_v26 = vadd.f32 %v418_v18, %v404_v17  ;;  %v407_v29 = vmax.f32 %v391_v33, 0.0  ;;  %v408_v43 = vmax.f32 %v392_v32, 0.0  ;;  %1159 = vmatpush3.msra.mxu0 %v688_v36  ;;  %v685_v10 = vld [vmem:[%s2011_s9 + $0x60] sm:$0xff]  ;;  %v684_v62 = vld [vmem:[%s2011_s9 + $0x58] sm:$0xff]  ;;  %v683_v11 = vld [vmem:[%s2011_s9 + $0x50] sm:$0xff]  ;;  %p1240_p0 = scmp.ne.s32.totalorder %s908_s7, %s1239_s20  ;;  %p1245_p2 = scmp.lt.s32.totalorder %s1239_s20, %s1239_s20 }
 0x186   :  { %v436_v20 = vadd.f32 %v435_v39, %v416_v13  ;;  %v409_v45 = vmax.f32 %v393_v38, 0.0  ;;  %1160 = vmatprep.subr.mxu0 %v1303_v14  ;;  %v682_v12 = vld [vmem:[%s2011_s9 + $0x48] sm:$0xff]  ;;  %v681_v2 = vld [vmem:[%s2011_s9 + $0x40] sm:$0xff]  ;;  %v680_v13 = vld [vmem:[%s2011_s9 + $0x38] sm:$0xff] }
 0x187   :  { %v420_v21 = vadd.f32 %v419_v26, %v405_v9  ;;  %1161 = vmatpush3.msra.mxu0 %v687_v58  ;;  %v679_v39 = vld [vmem:[%s2011_s9 + $0x30] sm:$0xff]  ;;  %v678_v16 = vld [vmem:[%s2011_s9 + $0x28] sm:$0xff]  ;;  %v677_v6 = vld [vmem:[%s2011_s9 + $0x20] sm:$0xff]  ;;  %p1246_p3 = por %p1245_p2, %p1244_p1 }
 0x188   :  { %v437_v31 = vadd.f32 %v436_v20, %v417_v19  ;;  %1162 = vmatprep.subr.mxu0 %v1303_v14  ;;  %v676_v17 = vld [vmem:[%s2011_s9 + $0x18] sm:$0xff]  ;;  %v675_v18 = vld [vmem:[%s2011_s9 + $0x10] sm:$0xff]  ;;  %v674_v19 = vld [vmem:[%s2011_s9 + $0x8] sm:$0xff] }
 0x189   :  { %v421_v40 = vadd.f32 %v420_v21, %v406_v24  ;;  %1163 = vmatpush3.msra.mxu0 %v686_v8  ;;  %v673_v20 = vld [vmem:[%s2011_s9] sm:$0xff]  ;;  %p1247_p4 = pnand %p1246_p3, %p1240_p0 }
 0x18a   :  { %v438_v25 = vrot.slane %v437_v31, 4  ;;  %1164 = vmatprep.subr.mxu0 %v1303_v14  ;;  %v797_v36 = vld [vmem:[%s2014_s12] sm:$0xff] }
 0x18b   :  { %v422_v37 = vadd.f32 %v421_v40, %v407_v29  ;;  %1165 = vmatpush3.msra.mxu0 %v685_v10 }
 0x18c   :  { %v439_v41 = vadd.f32 %v438_v25, %v437_v31  ;;  %1166 = vmatprep.subr.mxu0 %v1303_v14 }
 0x18d   :  { %v423_v15 = vadd.f32 %v422_v37, %v408_v43  ;;  %1167 = vmatpush3.msra.mxu0 %v684_v62 }
 0x18e   :  { %v440_v44 = vrot.slane %v439_v41, 2  ;;  %1168 = vmatprep.subr.mxu0 %v1303_v14 }
 0x18f   :  { %v424_v42 = vadd.f32 %v423_v15, %v409_v45  ;;  %1169 = vmatpush3.msra.mxu0 %v683_v11 }
 0x190   :  { %v441_v47 = vadd.f32 %v440_v44, %v439_v41  ;;  %1170 = vmatprep.subr.mxu0 %v1303_v14 }
 0x191   :  { %v425_v48 = vrot.slane %v424_v42, 4  ;;  %1171 = vmatpush3.msra.mxu0 %v682_v12 }
 0x192   :  { %v442_v51 = vrot.slane %v441_v47, 1  ;;  %1172 = vmatprep.subr.mxu0 %v1303_v14 }
 0x193   :  { %v426_v49 = vadd.f32 %v425_v48, %v424_v42  ;;  %1173 = vmatpush3.msra.mxu0 %v681_v2 }
 0x194   :  { %v443_v53 = vadd.f32 %v442_v51, %v441_v47  ;;  %1174 = vmatprep.subr.mxu0 %v1303_v14  ;;  %v934_v51 = vld [vmem:[%s2007_s5] ss:$0 sm:$0xff] }
 0x195   :  { %v427_v46 = vrot.slane %v426_v49, 2  ;;  %1175 = vmatpush3.msra.mxu0 %v680_v13 }
 0x196   :  { %v446_v57 = vmul.f32 0.015625, %v443_v53  ;;  %1176 = vmatprep.subr.mxu0 %v1303_v14 }
 0x197   :  { %v428_v52 = vadd.f32 %v427_v46, %v426_v49  ;;  %1177 = vmatpush3.msra.mxu0 %v679_v39 }
 0x198   :  { %1178 = vmatprep.subr.mxu0 %v1303_v14 }
 0x199   :  { %v429_v55 = vrot.slane %v428_v52, 1  ;;  %1179 = vmatpush3.msra.mxu0 %v678_v16 }
 0x19a   :  { %1180 = vmatprep.subr.mxu0 %v1303_v14 }
 0x19b   :  { %v430_v56 = vadd.f32 %v429_v55, %v428_v52  ;;  %1181 = vmatpush3.msra.mxu0 %v677_v6  ;;  %v935_v52 = vld [vmem:[%s2008_s6] ss:$0 sm:$0xff] }
 0x19c   :  { %1182 = vmatprep.subr.mxu0 %v1303_v14 }
 0x19d   :  { %v445_v23 = vmul.f32 0.015625, %v430_v56  ;;  %1183 = vmatpush3.msra.mxu0 %v676_v17 }
 0x19e   :  { %1184 = vmatprep.subr.mxu0 %v1303_v14 }
 0x19f   :  { %v450_v59 = vsel %vm449_vm1, %v446_v57, %v445_v23  ;;  %1185 = vmatpush3.msra.mxu0 %v675_v18  ;;  %v936_v57 = vld [vmem:[%s2010_s8] ss:$0 sm:$0xff] }
 0x1a0   :  { %1121 = vmatmul.mubr.f32.vlgmr.msra.gmra.mxu1 %v450_v59  ;;  %452 = vst [vmem:[#allocation2] sm:$0x3] %v450_v59  ;;  %1186 = vmatprep.subr.mxu0 %v1303_v14 }
 0x1a1   :  { %1155 = vmatprep.mubr.msk.f32.mxu1 %vm1304_vm0, %v1303_v14  ;;  %1124 = vmatpush3.msra.mxu1 %v594_v50 }
 0x1a2   :  { %1125 = vmatprep.subr.mxu1 %v1303_v14  ;;  %1187 = vmatpush3.msra.mxu0 %v674_v19 }
 0x1a3   :  { %1126 = vmatpush3.msra.mxu1 %v593_v60  ;;  %1188 = vmatprep.subr.mxu0 %v1303_v14  ;;  %v812_v60 = vld [vmem:[%s2014_s12 + $0x78] sm:$0xff] }
 0x1a4   :  { %1127 = vmatprep.subr.mxu1 %v1303_v14  ;;  %1189 = vmatpush3.msra.mxu0 %v673_v20 }
 0x1a5   :  { %1128 = vmatpush3.msra.mxu1 %v592_v61  ;;  %v811_v61 = vld [vmem:[%s2014_s12 + $0x70] sm:$0xff] }
 0x1a6   :  { %1129 = vmatprep.subr.mxu1 %v1303_v14 }
 0x1a7   :  { %1130 = vmatpush3.msra.mxu1 %v591_v63  ;;  %v810_v63 = vld [vmem:[%s2014_s12 + $0x68] sm:$0xff] }
 0x1a8   :  { %1131 = vmatprep.subr.mxu1 %v1303_v14 }
 0x1a9   :  { %1132 = vmatpush3.msra.mxu1 %v590_v0  ;;  %v809_v0 = vld [vmem:[%s2014_s12 + $0x60] sm:$0xff] }
 0x1aa   :  { %1133 = vmatprep.subr.mxu1 %v1303_v14 }
 0x1ab   :  { %1134 = vmatpush3.msra.mxu1 %v589_v27  ;;  %v808_v27 = vld [vmem:[%s2014_s12 + $0x58] sm:$0xff] }
 0x1ac   :  { %1135 = vmatprep.subr.mxu1 %v1303_v14 }
 0x1ad   :  { %1136 = vmatpush3.msra.mxu1 %v588_v28  ;;  %v807_v28 = vld [vmem:[%s2014_s12 + $0x50] sm:$0xff] }
 0x1ae   :  { %1137 = vmatprep.subr.mxu1 %v1303_v14 }
 0x1af   :  { %1138 = vmatpush3.msra.mxu1 %v587_v30  ;;  %v806_v30 = vld [vmem:[%s2014_s12 + $0x48] sm:$0xff] }
 0x1b0   :  { %1139 = vmatprep.subr.mxu1 %v1303_v14 }
 0x1b1   :  { %1140 = vmatpush3.msra.mxu1 %v586_v1  ;;  %v805_v1 = vld [vmem:[%s2014_s12 + $0x40] sm:$0xff] }
 0x1b2   :  { %1141 = vmatprep.subr.mxu1 %v1303_v14 }
 0x1b3   :  { %1142 = vmatpush3.msra.mxu1 %v585_v54  ;;  %v804_v54 = vld [vmem:[%s2014_s12 + $0x38] sm:$0xff] }
 0x1b4   :  { %1143 = vmatprep.subr.mxu1 %v1303_v14 }
 0x1b5   :  { %1144 = vmatpush3.msra.mxu1 %v584_v3  ;;  %v803_v3 = vld [vmem:[%s2014_s12 + $0x30] sm:$0xff] }
 0x1b6   :  { %1145 = vmatprep.subr.mxu1 %v1303_v14 }
 0x1b7   :  { %1146 = vmatpush3.msra.mxu1 %v583_v34  ;;  %v802_v34 = vld [vmem:[%s2014_s12 + $0x28] sm:$0xff] }
 0x1b8   :  { %1147 = vmatprep.subr.mxu1 %v1303_v14 }
 0x1b9   :  { %1148 = vmatpush3.msra.mxu1 %v582_v35  ;;  %v801_v35 = vld [vmem:[%s2014_s12 + $0x20] sm:$0xff] }
 0x1ba   :  { %1149 = vmatprep.subr.mxu1 %v1303_v14 }
 0x1bb   :  { %1150 = vmatpush3.msra.mxu1 %v581_v4  ;;  %v800_v4 = vld [vmem:[%s2014_s12 + $0x18] sm:$0xff] }
 0x1bc   :  { %1151 = vmatprep.subr.mxu1 %v1303_v14 }
 0x1bd   :  { %1152 = vmatpush3.msra.mxu1 %v580_v5  ;;  %v799_v5 = vld [vmem:[%s2014_s12 + $0x10] sm:$0xff] }
 0x1be   :  { %1153 = vmatprep.subr.mxu1 %v1303_v14 }
 0x1bf   :  { %1154 = vmatpush3.msra.mxu1 %v579_v7  ;;  %v798_v7 = vld [vmem:[%s2014_s12 + $0x8] sm:$0xff] }
 0x1c0   :  { %1193 = vmatprep.subr.mxu1 %v1303_v14 }
 0x260   :  { %v535_v22 = vpop.f32.mrf.mxu1 }
 0x261   :  { %v542_v33 = vsel %vm541_vm2, %v535_v22, 0.0 }
 0x262   :  { %v543_v9 = vrot.slane %v542_v33, 4  ;;  %v1122_v26 = vpop.f32.mrf.mxu1 }
 0x264   :  { %v544_v31 = vadd.f32 %v543_v9, %v542_v33 }
 0x266   :  { %v545_v32 = vrot.slane %v544_v31, 2 }
 0x268   :  { %v546_v24 = vadd.f32 %v545_v32, %v544_v31 }
 0x26a   :  { %v547_v21 = vrot.slane %v546_v24, 1 }
 0x26c   :  { %v548_v25 = vadd.f32 %v547_v21, %v546_v24  ;;  %v937_v24 = vld [vmem:[%s2012_s10] ss:$0 sm:$0xff] }
 0x26e   :  { %v550_v38 = vmul.f32 0.5, %v548_v25  ;;  %v938_v25 = vld [vmem:[%s2013_s11] ss:$0 sm:$0xff] }
 0x270   :  { %v551_v29 = vsub.f32 %v535_v22, %v550_v38 }
 0x272   :  { %v552_v40 = vmul.f32 %v551_v29, %v551_v29 }
 0x274   :  { %v553_v41 = vsel %vm541_vm2, %v552_v40, 0.0 }
 0x275   :  { %v554_v43 = vrot.slane %v553_v41, 4 }
 0x277   :  { %v555_v37 = vadd.f32 %v554_v43, %v553_v41 }
 0x279   :  { %v556_v44 = vrot.slane %v555_v37, 2 }
 0x27b   :  { %v557_v45 = vadd.f32 %v556_v44, %v555_v37 }
 0x27d   :  { %v558_v15 = vrot.slane %v557_v45, 1 }
 0x27f   :  { %v559_v42 = vadd.f32 %v558_v15, %v557_v45 }
 0x281   :  { %v560_v47 = vmul.f32 0.5, %v559_v42 }
 0x283   :  { %v561_v48 = vadd.f32 1e-05, %v560_v47 }
 0x285   :  { %1235 = vrsqrt.f32 %v561_v48 }
 0x292   :  { %v1236_v49 = vpop.eup %1235 }
 0x293   :  { %v563_v46 = vmul.f32 %v1236_v49, %v551_v29 }
 0x295   :  { %v570_v53 = vmul.f32 %v934_v51, %v563_v46 }
 0x297   :  { %v577_v55 = vadd.f32 %v935_v52, %v570_v53 }
 0x299   :  { %v578_v56 = vmax.f32 %v577_v55, 0.0 }
 0x29b   :  { %1156 = vmatmul.mubr.f32.vlgmr.msra.gmra.mxu1 %v578_v56 }
 0x29c   :  { %1225 = vmatprep.mubr.msk.f32.mxu1 %vm1304_vm0, %v1303_v14  ;;  %1194 = vmatpush3.msra.mxu1 %v812_v60 }
 0x29d   :  { %1195 = vmatprep.subr.mxu1 %v1303_v14 }
 0x29e   :  { %1196 = vmatpush3.msra.mxu1 %v811_v61 }
 0x29f   :  { %1197 = vmatprep.subr.mxu1 %v1303_v14 }
 0x2a0   :  { %1198 = vmatpush3.msra.mxu1 %v810_v63 }
 0x2a1   :  { %1199 = vmatprep.subr.mxu1 %v1303_v14 }
 0x2a2   :  { %1200 = vmatpush3.msra.mxu1 %v809_v0 }
 0x2a3   :  { %1201 = vmatprep.subr.mxu1 %v1303_v14 }
 0x2a4   :  { %1202 = vmatpush3.msra.mxu1 %v808_v27 }
 0x2a5   :  { %1203 = vmatprep.subr.mxu1 %v1303_v14 }
 0x2a6   :  { %1204 = vmatpush3.msra.mxu1 %v807_v28 }
 0x2a7   :  { %1205 = vmatprep.subr.mxu1 %v1303_v14 }
 0x2a8   :  { %1206 = vmatpush3.msra.mxu1 %v806_v30 }
 0x2a9   :  { %1207 = vmatprep.subr.mxu1 %v1303_v14 }
 0x2aa   :  { %1208 = vmatpush3.msra.mxu1 %v805_v1 }
 0x2ab   :  { %1209 = vmatprep.subr.mxu1 %v1303_v14 }
 0x2ac   :  { %1210 = vmatpush3.msra.mxu1 %v804_v54 }
 0x2ad   :  { %1211 = vmatprep.subr.mxu1 %v1303_v14 }
 0x2ae   :  { %1212 = vmatpush3.msra.mxu1 %v803_v3 }
 0x2af   :  { %1213 = vmatprep.subr.mxu1 %v1303_v14 }
 0x2b0   :  { %1214 = vmatpush3.msra.mxu1 %v802_v34 }
 0x2b1   :  { %1215 = vmatprep.subr.mxu1 %v1303_v14 }
 0x2b2   :  { %1216 = vmatpush3.msra.mxu1 %v801_v35 }
 0x2b3   :  { %1217 = vmatprep.subr.mxu1 %v1303_v14 }
 0x2b4   :  { %1218 = vmatpush3.msra.mxu1 %v800_v4 }
 0x2b5   :  { %1219 = vmatprep.subr.mxu1 %v1303_v14 }
 0x2b6   :  { %1220 = vmatpush3.msra.mxu1 %v799_v5 }
 0x2b7   :  { %1221 = vmatprep.subr.mxu1 %v1303_v14 }
 0x2b8   :  { %1222 = vmatpush3.msra.mxu1 %v798_v7 }
 0x2b9   :  { %1223 = vmatprep.subr.mxu1 %v1303_v14 }
 0x2ba   :  { %1224 = vmatpush3.msra.mxu1 %v797_v36 }
 0x35b   :  { %v668_v23 = vpop.f32.mrf.mxu1 }
 0x35c   :  { %v669_v59 = vadd.f32 %v936_v57, %v668_v23 }
 0x35d   :  { %v1157_v50 = vpop.f32.mrf.mxu1 }
 0x35e   :  { %672 = vst [vmem:[#allocation4] sm:$0x3] %v669_v59  ;;  %1191 = vmatmul.mubr.f32.vlgmr.msra.gmra.mxu0 %v669_v59 }
 0x41e   :  { %v755_v58 = vpop.f32.mrf.mxu0 }
 0x41f   :  { %v761_v8 = vsel %vm541_vm2, %v755_v58, 0.0 }
 0x420   :  { %v762_v10 = vrot.slane %v761_v8, 4  ;;  %v1192_v62 = vpop.f32.mrf.mxu0 }
 0x422   :  { %v763_v11 = vadd.f32 %v762_v10, %v761_v8 }
 0x424   :  { %v764_v12 = vrot.slane %v763_v11, 2 }
 0x426   :  { %v765_v2 = vadd.f32 %v764_v12, %v763_v11 }
 0x428   :  { %v766_v13 = vrot.slane %v765_v2, 1 }
 0x42a   :  { %v767_v39 = vadd.f32 %v766_v13, %v765_v2 }
 0x42c   :  { %v768_v16 = vmul.f32 0.5, %v767_v39 }
 0x42e   :  { %v769_v6 = vsub.f32 %v755_v58, %v768_v16 }
 0x430   :  { %v770_v17 = vmul.f32 %v769_v6, %v769_v6 }
 0x432   :  { %v771_v18 = vsel %vm541_vm2, %v770_v17, 0.0 }
 0x433   :  { %v772_v19 = vrot.slane %v771_v18, 4 }
 0x435   :  { %v773_v20 = vadd.f32 %v772_v19, %v771_v18 }
 0x437   :  { %v774_v22 = vrot.slane %v773_v20, 2 }
 0x439   :  { %v775_v14 = vadd.f32 %v774_v22, %v773_v20 }
 0x43b   :  { %v776_v33 = vrot.slane %v775_v14, 1 }
 0x43d   :  { %v777_v9 = vadd.f32 %v776_v33, %v775_v14 }
 0x43f   :  { %v778_v26 = vmul.f32 0.5, %v777_v9 }
 0x441   :  { %v779_v31 = vadd.f32 1e-05, %v778_v26 }
 0x443   :  { %1237 = vrsqrt.f32 %v779_v31 }
 0x450   :  { %v1238_v32 = vpop.eup %1237 }
 0x451   :  { %v781_v21 = vmul.f32 %v1238_v32, %v769_v6 }
 0x453   :  { %v788_v38 = vmul.f32 %v937_v24, %v781_v21 }
 0x455   :  { %v795_v29 = vadd.f32 %v938_v25, %v788_v38 }
 0x457   :  { %v796_v40 = vmax.f32 %v795_v29, 0.0 }
 0x459   :  { %1226 = vmatmul.mubr.f32.vlgmr.msra.gmra.mxu1 %v796_v40 }
 0x45a   :  { %1250 = shalt.err (!%p1247_p4)
}
 0x45b   :  { %910 = dma.vmem_to_hbm [thread:$0]  %s908_s7, 32, %s2017_s15, [#allocation5]  }
 0x45c   :  { %s1259_s11 = scalar_lea.vmem %s898_s3, 32  ;;  %p1264_p6 = scmp.lt.s32.totalorder %s898_s3, %s898_s3 }
 0x45d   :  { %p1260_p5 = scmp.ne.s32.totalorder %s898_s3, %s1259_s11  ;;  %p1265_p7 = scmp.lt.s32.totalorder %s1259_s11, %s1259_s11 }
 0x45f   :  { %p1266_p8 = por %p1265_p7, %p1264_p6 }
 0x461   :  { %p1267_p9 = pnand %p1266_p8, %p1260_p5 }
 0x463   :  { %1270 = shalt.err (!%p1267_p9)
}
 0x464   :  { %900 = dma.vmem_to_hbm [thread:$0]  %s898_s3, 32, %s2016_s14, [#allocation3]   ;;  %v939_v41 = vld [vmem:[%s2015_s13] ss:$0 sm:$0xff] }
 0x465   :  { %s1307_s24 = smov [#allocation6]  }
 0x466   :  { %s917_s25 = sshll.u32 %s1307_s24, 4  ;;  %s918_s25 = int_to_ptr.vmem [resolvable:$true] %s917_s25 }
 0x467   :  { %s1279_s15 = scalar_lea.vmem %s918_s25, 32  ;;  %p1284_p11 = scmp.lt.s32.totalorder %s918_s25, %s918_s25 }
 0x468   :  { %p1280_p10 = scmp.ne.s32.totalorder %s918_s25, %s1279_s15  ;;  %p1285_p12 = scmp.lt.s32.totalorder %s1279_s15, %s1279_s15 }
 0x46a   :  { %p1286_p13 = por %p1285_p12, %p1284_p11 }
 0x46c   :  { %p1287_p0 = pnand %p1286_p13, %p1280_p10 }
 0x519   :  { %v886_v43 = vpop.f32.mrf.mxu1 }
 0x51a   :  { %v887_v37 = vadd.f32 %v939_v41, %v886_v43 }
 0x51b   :  { %v1227_v44 = vpop.f32.mrf.mxu1 }
 0x51c   :  { %890 = vst [vmem:[#allocation6] sm:$0x3] %v887_v37 }
 0x51d   :  { %1290 = shalt.err (!%p1287_p0)
}
 0x51e   :  { %920 = dma.vmem_to_hbm [thread:$0]  %s918_s25, 32, %s2018_s16, [#allocation5]  }
 0x51f   :  { %1299 = dma.done.wait [#allocation3], 32  }
 0x520   :  { %1300 = vsyncadd [#allocation3], 4294967264 }
 0x521   :  { %1301 = dma.done.wait [#allocation5], 64  }
 0x522   :  { %1302 = vsyncadd [#allocation5], 4294967232 }
 0x523   :  { %930 = vsyncpa [#allocation3], 1 }
 0x524   :  { %931 = vsyncpa [#allocation5], 1 }

</bundles_post_ra>
